<compile_context>
chip_gen: v7x
topology: tpu7x:2x2x1
jax: 0.10.0
libtpu: 0.0.40
codegen_flags: <defaults>
</compile_context>

<pallas_src>
import jax
import jax.numpy as jnp
from jax import lax
from jax.experimental import pallas as pl
from jax.experimental.pallas import tpu as pltpu


def bilinear_matrix(out_size: int, in_size: int, dtype=jnp.float32) -> jnp.ndarray:
    """Dense 1-D interpolation matrix (out_size, in_size) matching
    F.interpolate(mode='bilinear', align_corners=True)."""
    if out_size > 1 and in_size > 1:
        src = jnp.arange(out_size, dtype=jnp.float32) * (in_size - 1) / (out_size - 1)
    else:
        src = jnp.zeros((out_size,), jnp.float32)
    i0 = jnp.clip(jnp.floor(src).astype(jnp.int32), 0, in_size - 1)
    i1 = jnp.clip(i0 + 1, 0, in_size - 1)
    frac = src - i0.astype(jnp.float32)
    rows = jnp.arange(out_size)
    A = jnp.zeros((out_size, in_size), dtype)
    A = A.at[rows, i0].add((1.0 - frac).astype(dtype))
    A = A.at[rows, i1].add(frac.astype(dtype))
    return A


def _deconv_kernel(cols_ref, w_ref, b_ref, a_ref, o_ref, acc_ref):
    # cols_ref: (Nb, K, HW)          bf16  im2col patches for Nb images
    # w_ref   : (C_out, K)           bf16  conv weight as a dense matrix
    # b_ref   : (Nb*C_out, 1)        f32   conv bias (tiled per image in wrapper)
    # a_ref   : (HW, HW2_pad)        bf16  fused (kron) bilinear upsample matrix
    # o_ref   : (Nb*C_out, HW2_pad)  f32   lane-dense flattened output slab
    # acc_ref : (Nb*C_out, HW)       f32   VMEM scratch (conv accumulator)
    nb = cols_ref.shape[0]
    c_out = w_ref.shape[0]

    # Small per-image conv matmuls -> f32 scratch rows (statically unrolled).
    for i in range(nb):
        acc_ref[i * c_out:(i + 1) * c_out, :] = jnp.dot(
            w_ref[...], cols_ref[i], preferred_element_type=jnp.float32)

    # One big bf16 x bf16 upsample matmul with f32 accumulation (dominant FLOPs,
    # full-row MXU occupancy = Nb*C_out).
    out = jnp.dot(acc_ref[...].astype(jnp.bfloat16), a_ref[...],
                  preferred_element_type=jnp.float32)        # (Nb*C_out, HW2_pad)

    # Bias added after the upsample, in f32 (exact; A_up columns sum to 1).
    o_ref[...] = (out + b_ref[...]).astype(o_ref.dtype)


def _pick_nb(n: int, c_out: int, target_rows: int = 256) -> int:
    """Images per grid step: fill MXU rows (~256) but keep >= 2 grid steps (v7x)."""
    nb = min(n, max(1, -(-target_rows // c_out)))
    if n >= 2:
        nb = min(nb, -(-n // 2))          # ceil(n/2): at least 2 steps for 2 TCs
    return max(1, nb)


def deconv_forward(x, weight, bias, *, kernel_size=3, padding=0, scale_factor=2):
    """x: (N, C_in, H, W) f32 NCHW. weight: (C_out, C_in, KH, KW). bias: (C_out,)."""
    N, C_in, H, W = x.shape
    C_out, _, KH, KW = weight.shape
    assert KH == kernel_size and KW == kernel_size

    xp = jnp.pad(x, ((0, 0), (0, 0), (padding, padding), (padding, padding)))
    Hp, Wp = H + 2 * padding, W + 2 * padding
    Ho, Wo = Hp - KH + 1, Wp - KW + 1
    Ho2, Wo2 = int(Ho * scale_factor), int(Wo * scale_factor)
    K = C_in * KH * KW
    HW, HW2 = Ho * Wo, Ho2 * Wo2
    HW2_pad = -(-HW2 // 128) * 128        # lane-dense: pad to multiple of 128

    # ---- batching: Nb images per grid step; pad N so Nb divides it.
    Nb = _pick_nb(N, C_out)
    n_steps = -(-N // Nb)
    N_pad = n_steps * Nb

    # ---- im2col: (N_pad, K, HW), K ordered (C_in, kh, kw) to match OIHW weights.
    patches = [xp[:, :, kh:kh + Ho, kw:kw + Wo]
               for kh in range(KH) for kw in range(KW)]
    cols = jnp.stack(patches, axis=2)                       # (N, C_in, KH*KW, Ho, Wo)
    cols = cols.reshape(N, K, HW)
    if N_pad != N:
        cols = jnp.pad(cols, ((0, N_pad - N), (0, 0), (0, 0)))
    cols = cols.astype(jnp.bfloat16)

    w_mat = weight.reshape(C_out, K).astype(jnp.bfloat16)            # (C_out, K)
    b_tiled = jnp.tile(bias.reshape(C_out, 1).astype(jnp.float32),   # (Nb*C_out, 1)
                       (Nb, 1))

    # ---- fused bilinear upsample matrix (bf16), column-padded for unmasked stores.
    A_h = bilinear_matrix(Ho2, Ho)                    # (Ho2, Ho)
    A_w = bilinear_matrix(Wo2, Wo)                    # (Wo2, Wo)
    A_up = jnp.kron(A_h, A_w).T                       # (HW, HW2)
    A_up = jnp.pad(A_up, ((0, 0), (0, HW2_pad - HW2))).astype(jnp.bfloat16)

    rows = Nb * C_out
    cost = pl.CostEstimate(
        flops=2 * N_pad * C_out * HW * (K + HW2_pad),
        transcendentals=0,
        bytes_accessed=(cols.size * 2 + w_mat.size * 2 + b_tiled.size * 4
                        + A_up.size * 2 + N_pad * C_out * HW2_pad * 4),
    )

    out2d = pl.pallas_call(
        _deconv_kernel,
        out_shape=jax.ShapeDtypeStruct((N_pad * C_out, HW2_pad), x.dtype),
        grid_spec=pltpu.PrefetchScalarGridSpec(
            num_scalar_prefetch=0,
            grid=(n_steps,),
            in_specs=[
                pl.BlockSpec((Nb, K, HW), lambda n: (n, 0, 0)),
                pl.BlockSpec((C_out, K), lambda n: (0, 0)),
                pl.BlockSpec((rows, 1), lambda n: (0, 0)),
                pl.BlockSpec((HW, HW2_pad), lambda n: (0, 0)),
            ],
            out_specs=pl.BlockSpec((rows, HW2_pad), lambda n: (n, 0)),
            scratch_shapes=[pltpu.VMEM((rows, HW), jnp.float32)],
        ),
        compiler_params=pltpu.CompilerParams(dimension_semantics=("parallel",)),
        cost_estimate=cost,
    )(cols, w_mat, b_tiled, A_up)

    out = out2d.reshape(N_pad, C_out, HW2_pad)[:N, :, :HW2]
    return out.reshape(N, C_out, Ho2, Wo2)


def _reference(x, weight, bias, *, padding=0, scale_factor=2):
    """Pure-JAX f32 reference (same math as the PyTorch deconv.forward)."""
    y = lax.conv_general_dilated(
        x, weight, window_strides=(1, 1),
        padding=[(padding, padding), (padding, padding)],
        dimension_numbers=("NCHW", "OIHW", "NCHW"),
        precision=lax.Precision.HIGHEST)
    y = y + bias.reshape(1, -1, 1, 1)
    Ho, Wo = y.shape[2], y.shape[3]
    A_h = bilinear_matrix(Ho * scale_factor, Ho)
    A_w = bilinear_matrix(Wo * scale_factor, Wo)
    t = jnp.einsum("oh,nchw->ncow", A_h, y, precision=lax.Precision.HIGHEST)
    return jnp.einsum("ncow,vw->ncov", t, A_w, precision=lax.Precision.HIGHEST)


if __name__ == "__main__":
    # deconv(input_channel=4, output_channel=8, kernel_size=3, padding=0, scale_factor=2)
    N, C_in, C_out, H, W = 2, 4, 8, 16, 16
    KS, PAD, SCALE = 3, 0, 2

    key = jax.random.PRNGKey(0)
    kx, kw, kb = jax.random.split(key, 3)
    x = jax.random.normal(kx, (N, C_in, H, W), jnp.float32)
    weight = 0.1 * jax.random.normal(kw, (C_out, C_in, KS, KS), jnp.float32)
    bias = 0.1 * jax.random.normal(kb, (C_out,), jnp.float32)

    out = deconv_forward(x, weight, bias, kernel_size=KS, padding=PAD, scale_factor=SCALE)
    out = jax.block_until_ready(out)

    ref = jax.block_until_ready(_reference(x, weight, bias, padding=PAD, scale_factor=SCALE))
    assert out.shape == (N, C_out, (H - KS + 1) * SCALE, (W - KS + 1) * SCALE)
    # bf16 conv operands + bf16 upsample matmul (f32 accumulation, f32 bias):
    # tolerance covers the bf16 rounding of inputs / accumulator / A_up.
    assert jnp.max(jnp.abs(out - ref)) < 3e-2

    print("KERNEL_OK")
</pallas_src>

<mosaic_0001>
module attributes {stable_mosaic.version = 11 : i64} {
  func.func @_deconv_kernel(%arg0: i32, %arg1: memref<1x36x196xbf16, #tpu.memory_space<vmem>>, %arg2: memref<8x36xbf16, #tpu.memory_space<vmem>>, %arg3: memref<8x1xf32, #tpu.memory_space<vmem>>, %arg4: memref<196x896xbf16, #tpu.memory_space<vmem>>, %arg5: memref<8x896xf32, #tpu.memory_space<vmem>>, %arg6: memref<8x196xf32, #tpu.memory_space<vmem>>) attributes {dimension_semantics = [#tpu.dimension_semantics<parallel>], iteration_bounds = array<i64: 2>, scalar_prefetch = 0 : i64, scratch_operands = 1 : i64, tpu.core_type = #tpu.core_type<tc>, window_params = [{transform_indices = @transform_0, window_bounds = array<i64: 1, 36, 196>}, {pipeline_mode = #tpu.pipeline_mode<synchronous>, transform_indices = @transform_1, window_bounds = array<i64: 8, 36>}, {pipeline_mode = #tpu.pipeline_mode<synchronous>, transform_indices = @transform_2, window_bounds = array<i64: 8, 1>}, {pipeline_mode = #tpu.pipeline_mode<synchronous>, transform_indices = @transform_3, window_bounds = array<i64: 196, 896>}, {transform_indices = @transform_4, window_bounds = array<i64: 8, 896>}]} {
    %c0 = arith.constant 0 : index
    %c0_0 = arith.constant 0 : index
    %0 = vector.load %arg2[%c0, %c0_0] : memref<8x36xbf16, #tpu.memory_space<vmem>>, vector<8x36xbf16>
    %c0_1 = arith.constant 0 : index
    %c0_2 = arith.constant 0 : index
    %c0_3 = arith.constant 0 : index
    %1 = vector.load %arg1[%c0_1, %c0_2, %c0_3] : memref<1x36x196xbf16, #tpu.memory_space<vmem>>, vector<1x36x196xbf16>
    %2 = vector.shape_cast %1 : vector<1x36x196xbf16> to vector<36x196xbf16>
    %cst = arith.constant dense<0.000000e+00> : vector<8x196xf32>
    %3 = tpu.matmul %0, %2, %cst {dimension_numbers = #tpu.dot_dimension_numbers<[1], [0], [0], [1], [0, 0, 1, 1], [], []>} : vector<8x36xbf16>, vector<36x196xbf16>, vector<8x196xf32> -> vector<8x196xf32>
    %c0_4 = arith.constant 0 : index
    %c0_5 = arith.constant 0 : index
    %4 = vector.load %arg6[%c0_4, %c0_5] : memref<8x196xf32, #tpu.memory_space<vmem>>, vector<8x196xf32>
    tpu.vector_store %arg6[%c0_4, %c0_5], %3 {strides = array<i32>} : memref<8x196xf32, #tpu.memory_space<vmem>>, vector<8x196xf32>,
    %c0_6 = arith.constant 0 : index
    %c0_7 = arith.constant 0 : index
    %5 = vector.load %arg6[%c0_6, %c0_7] : memref<8x196xf32, #tpu.memory_space<vmem>>, vector<8x196xf32>
    %6 = arith.truncf %5 : vector<8x196xf32> to vector<8x196xbf16>
    %c0_8 = arith.constant 0 : index
    %c0_9 = arith.constant 0 : index
    %7 = vector.load %arg4[%c0_8, %c0_9] : memref<196x896xbf16, #tpu.memory_space<vmem>>, vector<196x896xbf16>
    %cst_10 = arith.constant dense<0.000000e+00> : vector<8x896xf32>
    %8 = tpu.matmul %6, %7, %cst_10 {dimension_numbers = #tpu.dot_dimension_numbers<[1], [0], [0], [1], [0, 0, 1, 1], [], []>} : vector<8x196xbf16>, vector<196x896xbf16>, vector<8x896xf32> -> vector<8x896xf32>
    %c0_11 = arith.constant 0 : index
    %c0_12 = arith.constant 0 : index
    %9 = vector.load %arg3[%c0_11, %c0_12] : memref<8x1xf32, #tpu.memory_space<vmem>>, vector<8x1xf32>
    %10 = vector.broadcast %9 : vector<8x1xf32> to vector<8x896xf32>
    %11 = arith.addf %8, %10 : vector<8x896xf32>
    %c0_13 = arith.constant 0 : index
    %c0_14 = arith.constant 0 : index
    %12 = vector.load %arg5[%c0_13, %c0_14] : memref<8x896xf32, #tpu.memory_space<vmem>>, vector<8x896xf32>
    tpu.vector_store %arg5[%c0_13, %c0_14], %11 {strides = array<i32>} : memref<8x896xf32, #tpu.memory_space<vmem>>, vector<8x896xf32>,
    return
  }
  func.func @transform_0(%arg0: i32) -> (i32, i32, i32) {
    %c0_i32 = arith.constant 0 : i32
    %c0_i32_0 = arith.constant 0 : i32
    %c0_i32_1 = arith.constant 0 : i32
    return %arg0, %c0_i32, %c0_i32_0 : i32, i32, i32
  }
  func.func @transform_1(%arg0: i32) -> (i32, i32) {
    %c0_i32 = arith.constant 0 : i32
    %c0_i32_0 = arith.constant 0 : i32
    %c0_i32_1 = arith.constant 0 : i32
    return %c0_i32, %c0_i32_0 : i32, i32
  }
  func.func @transform_2(%arg0: i32) -> (i32, i32) {
    %c0_i32 = arith.constant 0 : i32
    %c0_i32_0 = arith.constant 0 : i32
    %c0_i32_1 = arith.constant 0 : i32
    return %c0_i32, %c0_i32_0 : i32, i32
  }
  func.func @transform_3(%arg0: i32) -> (i32, i32) {
    %c0_i32 = arith.constant 0 : i32
    %c0_i32_0 = arith.constant 0 : i32
    %c0_i32_1 = arith.constant 0 : i32
    return %c0_i32, %c0_i32_0 : i32, i32
  }
  func.func @transform_4(%arg0: i32) -> (i32, i32) {
    %c0_i32 = arith.constant 0 : i32
    %c0_i32_0 = arith.constant 0 : i32
    return %arg0, %c0_i32 : i32, i32
  }
}

</mosaic_0001>

<bundles_post_ra>
// kernel: tpu_custom_call.1
= control target key start
LH: loop header
LB: loop body
LE: loop exit
PB: predicated region body
PF: predicated region fallthrough
CT: control target
= control target key end

     0   :  { %9 = vsyncpa [#allocation4], 0  ;;  %s1751_s0 = inlined_call_operand.vmem [shape: bf16[2,36,196], index: 0, kind: input, shape index: {}]   ;;  %s1752_s1 = inlined_call_operand.vmem [shape: bf16[8,36], index: 1, kind: input, shape index: {}]   ;;  %s1753_s2 = inlined_call_operand.vmem [shape: f32[8,1], index: 2, kind: input, shape index: {}]   ;;  %s1754_s3 = inlined_call_operand.hbm [shape: bf16[196,896], index: 3, kind: input, shape index: {}]   ;;  %s1755_s4 = inlined_call_operand.hbm [shape: f32[16,896], index: 4, kind: output, shape index: {}]  }
   0x1   :  { %10 = vsyncpa [#allocation5], 0 }
   0x2   :  { %12 = vsyncpa [#allocation5 + $0x1], 0  ;;  %s1571_s15 = smov 0   ;;  %s1573_s16 = smov 0  }
   0x3   :  { %s1575_s17 = smov 0   ;;  %s1577_s18 = smov 0  }
   0x4 LB: > { %s1592_s19 = sadd.s32 4294967295, %s1539_s18   ;;  %s1138_s20 = sadd.s32 4294967294, %s1539_s18   ;;  %s1539_s18 = sphi %s1577_s18, %s1771_s18   ;;  %s1535_s17 = sphi %s1575_s17, %s1770_s17   ;;  %s1531_s16 = sphi %s1573_s16, %s1769_s16   ;;  %s1527_s15 = sphi %s1571_s15, %s1768_s15  }
   0x5   : > { %s1596_s21 = sadd.s32 1, %s1539_s18   ;;  %s114_s22 = sadd.s32 1, %s1535_s17 }
   0x6   : > { %s111_s23 = ssub.s32 %s1539_s18, %s1596_s21  ;;  %p124_p0 = scmp.ne.s32.totalorder %s1535_s17, %s1531_s16 }
   0x7   : > { %p112_p1 = scmp.eq.s32.totalorder %s111_s23, 0  ;;  %p125_p2 = scmp.eq.s32.totalorder %s1592_s19, 1 }
   0x8   : > { %p130_p3 = scmp.ne.s32.totalorder %s1531_s16, %s1527_s15  ;;  %p131_p4 = scmp.eq.s32.totalorder %s1138_s20, 1 }
   0x9   : > { %s1607_s24 = scalar_select %p112_p1, %s1535_s17, %s114_s22  }
   0xa   : > { %p1609_p5 = por %p125_p2, %p124_p0  ;;  %p1613_p6 = por %p131_p4, %p130_p3 }
   0xb   : > { %p1139_p7 = scmp.ge.s32.totalorder %s1539_s18, 1  ;;  %p138_p8 = scmp.lt.s32.totalorder %s1539_s18, 3 }
   0xc   : > { %s1759_s25 = scalar_select %p1609_p5, 1, 0 }
   0xd   : > { %s1760_s26 = scalar_select %p1613_p6, 1, 0 }
   0xe   : > { %p1756_p9 = scmp.eq.s32.totalorder %s1592_s19, 0  ;;  %p1620_p10 = pnand %p1139_p7, %p138_p8 }
   0xf   : > { %s1541_s28 = smov [#allocation3]   ;;  %s1445_s7 = scalar_lea.hbm %s1754_s3, 11200 }
  0x10   : > { %s1761_s27 = scalar_select %p1620_p10, 1, 0 }
  0x11   : > { %s156_s29 = sshll.u32 %s1541_s28, 4  ;;  %p1263_p11 = pneg %p1620_p10  ;;  %s157_s29 = int_to_ptr.vmem [resolvable:$true] %s156_s29 }
  0x12   : > { %p1446_p13 = scmp.ne.s32.totalorder %s1754_s3, %s1445_s7  ;;  %p1452_p3 = scmp.lt.u32.totalorder %s1445_s7, %s1754_s3 }
  0x13   : > { %p1628_p12 = pnand %p1756_p9, %p1263_p11 }
  0x15   : > { %p1447_p0 = pneg %p1628_p12 }
  0x17   : > { %p1448_p1 = pnand %p1447_p0, %p1446_p13 }
  0x19   : > { %p1449_p2 = pneg %p1448_p1 }
  0x1b   : > { %p1454_p4 = pnand %p1452_p3, %p1449_p2 }
  0x1d   : > { %1457 = shalt.err (!%p1454_p4)
}
  0x1e   : > { %s1458_s12 = scalar_lea.vmem %s157_s29, 11200  ;;  %p1466_p9 = scmp.lt.s32.totalorder %s157_s29, %s157_s29 }
  0x1f   : > { %p1459_p7 = scmp.ne.s32.totalorder %s157_s29, %s1458_s12  ;;  %p1467_p6 = scmp.lt.s32.totalorder %s1458_s12, %s1458_s12 }
  0x21   : > { %p1461_p8 = pnand %p1459_p7, %p1447_p0  ;;  %p1468_p5 = por %p1467_p6, %p1466_p9 }
  0x23   : > { %p1462_p11 = pneg %p1461_p8 }
  0x25   : > { %p1469_p10 = pnand %p1468_p5, %p1462_p11 }
  0x27   : > { %1472 = shalt.err (!%p1469_p10)
}
  0x28   : > { %s1542_s13 = smov 448   ;;  %s1543_s14 = smov 28  }
  0x29   : > { %1266 = dma.hbm_to_vmem [thread:$0]  (!%p1628_p12), %s1754_s3, 11200, %s157_s29, [#allocation4], %s1542_s13, %s1542_s13, %s1543_s14  }
  0x2a   : > { %p1763_p13 = scmp.ne.s32.totalorder %s1761_s27, 0 }
  0x2b   : > { %p1764_p1 = scmp.eq.s32.totalorder (!%p1763_p13), %s1592_s19, 0 }
  0x2c   : > { %180 = sbr.rel (%p1763_p13) target bundleno = 577 (0x241), region = 36 }
  0x33   : > { %1518 = dma.done.wait (%p1764_p1), [#allocation4], 11200   ;;  %p1765_p0 = pmov %p1764_p1 }
  0x34   : > { %p206_p5 = scmp.lt.s32.totalorder %s1592_s19, 1  ;;  %v1544_v0 = vmov 0   ;;  %v1319_v8 = vld [vmem:[#allocation3 + $0x4] ss:$28 sps:$4 sm:$0xff]   ;;  %vm247_vm0 = vcmask 1041408   ;;  %vm243_vm1 = vcmask 293888  }
  0x35   : > { %1520 = vsyncadd (%p1765_p0), [#allocation4], 4294956096  ;;  %286 = vmatprep.mubr.bf16.mxu0 %v1544_v0  ;;  %1310 = vset.pattern.permute.xlu0 %v1544_v0  ;;  %v1324_v9 = vld [vmem:[#allocation3] ss:$28 sps:$4 sm:$0xff]   ;;  %v1323_v12 = vld [vmem:[#allocation3 + $0xc] ss:$28 sps:$4 sm:$0xff]  }
  0x36   : > { %s207_s23 = scalar_select %p206_p5, %s1592_s19, 1  ;;  %882 = vmatprep.subr.bf16.mxu1 %v1319_v8  ;;  %v1325_v10 = vld [vmem:[#allocation3 + $0x3c] ss:$28 sps:$4 sm:$0xff]   ;;  %v1331_v14 = vld [vmem:[#allocation3 + $0x74] ss:$28 sps:$4 sm:$0xff]   ;;  %vm296_vm2 = vcmask 556032  }
  0x37   : > { %883 = vmatpush1.bf16.msra.mxu1 %v1324_v9  ;;  %v1330_v13 = vld [vmem:[#allocation3 + $0x38] ss:$28 sps:$4 sm:$0xff]   ;;  %v212_v15 = vld [vmem:[%s1752_s1] sm:$0xf]  ;;  %v1321_v16 = vld [vmem:[#allocation3 + $0x8] ss:$28 sps:$4 sm:$0xff]  }
  0x38   : > { %s1255_s28 = smul.u32 40, %s207_s23  ;;  %884 = vmatprep.subr.bf16.mxu1 %v1325_v10  ;;  %v1329_v17 = vld [vmem:[#allocation3 + $0x44] ss:$28 sps:$4 sm:$0xff]   ;;  %v1336_v18 = vld [vmem:[#allocation3 + $0x70] ss:$28 sps:$4 sm:$0xff]   ;;  %s203_s9 = sand.u32 1, %s1531_s16  }
  0x39   : > { %v1337_v19 = vld [vmem:[#allocation3 + $0xac] ss:$28 sps:$4 sm:$0xff]   ;;  %v1327_v20 = vld [vmem:[#allocation3 + $0x40] ss:$28 sps:$4 sm:$0xff]   ;;  %v1333_v24 = vld [vmem:[#allocation3 + $0x78] ss:$28 sps:$4 sm:$0xff]  }
  0x3a   : > { %s210_s27 = scalar_lea.vmem %s1751_s0, %s1255_s28  ;;  %v1335_v21 = vld [vmem:[#allocation3 + $0x7c] ss:$28 sps:$4 sm:$0xff]   ;;  %v1342_v22 = vld [vmem:[#allocation3 + $0xa8] ss:$28 sps:$4 sm:$0xff]   ;;  %v1341_v25 = vld [vmem:[#allocation3 + $0xb4] ss:$28 sps:$4 sm:$0xff]  }
  0x3b   : > { %v1311_v1 = vld [vmem:[%s210_s27 + $0x4] ss:$8 sps:$4 sm:$0xff]   ;;  %v1313_v2 = vld [vmem:[%s210_s27] ss:$8 sps:$4 sm:$0xff]   ;;  %v1314_v3 = vld [vmem:[%s210_s27 + $0x14] ss:$8 sps:$4 sm:$0xff]   ;;  %885 = vmatpush1.bf16.msra.mxu1 %v1330_v13 }
  0x3c   : > { %254 = vmatprep.subr.bf16.mxu0 %v1311_v1  ;;  %v217_v4 = vld [vmem:[%s210_s27 + $0x20] sm:$0x33]  ;;  %v1316_v5 = vld [vmem:[%s210_s27 + $0x10] ss:$8 sps:$4 sm:$0xff]   ;;  %886 = vmatprep.subr.bf16.mxu1 %v1331_v14  ;;  %v1349_v27 = vld [vmem:[#allocation3 + $0x11c] ss:$28 sps:$4 sm:$0xff]  }
  0x3d   : > { %255 = vmatpush1.bf16.msra.mxu0 %v1313_v2  ;;  %v1150_v6 = vcombine.high %v217_v4, %v217_v4  ;;  %v1149_v7 = vcombine.low %v217_v4, %v217_v4  ;;  %v1343_v23 = vld [vmem:[#allocation3 + $0xe4] ss:$28 sps:$4 sm:$0xff]   ;;  %v1339_v28 = vld [vmem:[#allocation3 + $0xb0] ss:$28 sps:$4 sm:$0xff]   ;;  %v1354_v30 = vld [vmem:[#allocation3 + $0x118] ss:$28 sps:$4 sm:$0xff]  }
  0x3e   : > { %256 = vmatprep.subr.bf16.mxu0 %v1314_v3  ;;  %v1348_v26 = vld [vmem:[#allocation3 + $0xe0] ss:$28 sps:$4 sm:$0xff]   ;;  %v1347_v29 = vld [vmem:[#allocation3 + $0xec] ss:$28 sps:$4 sm:$0xff]   ;;  %v1355_v31 = vld [vmem:[#allocation3 + $0x154] ss:$28 sps:$4 sm:$0xff]  }
  0x3f   : > { %v249_v11 = vsel %vm247_vm0, %v1149_v7, 0  ;;  %887 = vmatpush1.bf16.msra.mxu1 %v1336_v18  ;;  %v1345_v32 = vld [vmem:[#allocation3 + $0xe8] ss:$28 sps:$4 sm:$0xff]   ;;  %v1360_v34 = vld [vmem:[#allocation3 + $0x150] ss:$28 sps:$4 sm:$0xff]   ;;  %s1254_s10 = smul.u32 56, %s203_s9 }
  0x40   : > { %888 = vmatprep.subr.bf16.mxu1 %v1337_v19  ;;  %v1353_v33 = vld [vmem:[#allocation3 + $0x124] ss:$28 sps:$4 sm:$0xff]   ;;  %v1361_v36 = vld [vmem:[#allocation3 + $0x18c] ss:$28 sps:$4 sm:$0xff]   ;;  %v1359_v37 = vld [vmem:[#allocation3 + $0x15c] ss:$28 sps:$4 sm:$0xff]  }
  0x41   : > { %257 = vmatpush1.bf16.msra.mxu0 %v1316_v5  ;;  %v1351_v35 = vld [vmem:[#allocation3 + $0x120] ss:$28 sps:$4 sm:$0xff]   ;;  %v1366_v38 = vld [vmem:[#allocation3 + $0x188] ss:$28 sps:$4 sm:$0xff]   ;;  %v1357_v40 = vld [vmem:[#allocation3 + $0x158] ss:$28 sps:$4 sm:$0xff]  }
  0x42   : > { %1151 = vmatprep.subr.msk.bf16.mxu0 %vm247_vm0, %v1150_v6  ;;  %v1367_v39 = vld [vmem:[#allocation3 + $0x1c4] ss:$28 sps:$4 sm:$0xff]   ;;  %v1365_v41 = vld [vmem:[#allocation3 + $0x194] ss:$28 sps:$4 sm:$0xff]   ;;  %v1373_v43 = vld [vmem:[#allocation3 + $0x1fc] ss:$28 sps:$4 sm:$0xff]  }
  0x43   : > { %889 = vmatpush1.bf16.msra.mxu1 %v1342_v22  ;;  %v1372_v42 = vld [vmem:[#allocation3 + $0x1c0] ss:$28 sps:$4 sm:$0xff]   ;;  %v1363_v44 = vld [vmem:[#allocation3 + $0x190] ss:$28 sps:$4 sm:$0xff]   ;;  %v1378_v46 = vld [vmem:[#allocation3 + $0x1f8] ss:$28 sps:$4 sm:$0xff]  }
  0x44   : > { %890 = vmatprep.subr.bf16.mxu1 %v1343_v23  ;;  %v1371_v45 = vld [vmem:[#allocation3 + $0x1cc] ss:$28 sps:$4 sm:$0xff]   ;;  %v1377_v48 = vld [vmem:[#allocation3 + $0x204] ss:$28 sps:$4 sm:$0xff]   ;;  %v382_v50 = vld [vmem:[#allocation3 + $0x230] sm:$0xff]  ;;  %s205_s11 = scalar_lea.vmem [#allocation6], %s1254_s10 }
  0x45   : > { %259 = vmatpush1.bf16.msra.mxu0 %v249_v11  ;;  %v1369_v47 = vld [vmem:[#allocation3 + $0x1c8] ss:$28 sps:$4 sm:$0xff]   ;;  %v1375_v49 = vld [vmem:[#allocation3 + $0x200] ss:$28 sps:$4 sm:$0xff]   ;;  %v386_v51 = vld [vmem:[#allocation3 + $0x24c] sm:$0xff]  ;;  %s1256_s12 = smul.u32 896, %s1592_s19 }
  0x46   : > { %923 = vmatprep.subr.bf16.mxu0 %v1323_v12  ;;  %v1379_v52 = vld [vmem:[#allocation3 + $0x234] ss:$28 sps:$4 sm:$0xff]   ;;  %v1383_v54 = vld [vmem:[#allocation3 + $0x23c] ss:$28 sps:$4 sm:$0xff]   ;;  %v1223_v55 = vcombine.low %v382_v50, %v386_v51  ;;  %v1384_v56 = vld [vmem:[#allocation3 + $0x26c] ss:$28 sps:$4 sm:$0xff]  }
  0x47   : > { %891 = vmatpush1.bf16.msra.mxu1 %v1348_v26  ;;  %v1381_v53 = vld [vmem:[#allocation3 + $0x238] ss:$28 sps:$4 sm:$0xff]   ;;  %v1386_v58 = vld [vmem:[#allocation3 + $0x270] ss:$28 sps:$4 sm:$0xff]   ;;  %v1389_v59 = vld [vmem:[#allocation3 + $0x268] ss:$28 sps:$4 sm:$0xff]   ;;  %s1707_s22 = scalar_lea.hbm %s1755_s4, %s1256_s12 }
  0x48   : > { %1152 = vmatmul.mubr.msk.bf16.vlgmr.msra.gmra.mrb[0].mxu0 %vm243_vm1, %v212_v15  ;;  %892 = vmatprep.subr.bf16.mxu1 %v1349_v27  ;;  %v1388_v57 = vld [vmem:[#allocation3 + $0x274] ss:$28 sps:$4 sm:$0xff]   ;;  %v398_v60 = vld [vmem:[#allocation3 + $0x2a0] sm:$0x33]  ;;  %v399_v62 = vld [vmem:[#allocation3 + $0x2a8] sm:$0x33] }
  0x49   : > { %924 = vmatpush1.bf16.msra.mxu0 %v1321_v16  ;;  %v1238_v61 = vcombine.high %v398_v60, %v398_v60  ;;  %v1237_v63 = vcombine.low %v398_v60, %v398_v60  ;;  %v1240_v1 = vcombine.high %v399_v62, %v399_v62  ;;  %v1239_v2 = vcombine.low %v399_v62, %v399_v62  ;;  %v1396_v5 = vld [vmem:[#allocation3 + $0x14] ss:$28 sps:$4 sm:$0xff]   ;;  %v1400_v16 = vld [vmem:[#allocation3 + $0x4c] ss:$28 sps:$4 sm:$0xff]   ;;  %v1404_v19 = vld [vmem:[#allocation3 + $0x84] ss:$28 sps:$4 sm:$0xff]  }
  0x4a   : > { %925 = vmatprep.subr.bf16.mxu0 %v1329_v17  ;;  %v402_v6 = vld [vmem:[%s1753_s2] sm:$0xff]  ;;  %v1398_v17 = vld [vmem:[#allocation3 + $0x48] ss:$28 sps:$4 sm:$0xff]   ;;  %v1408_v22 = vld [vmem:[#allocation3 + $0xbc] ss:$28 sps:$4 sm:$0xff]   ;;  %s1067_s13 = sshll.u32 %s205_s11, 4  ;;  %s1709_s13 = int_to_ptr.vmem [resolvable:$true] %s1067_s13 }
  0x4b   : > { %893 = vmatpush1.bf16.msra.mxu1 %v1354_v30  ;;  %v862_v3 = vsel %vm247_vm0, %v1237_v63, 0  ;;  %v868_v4 = vsel %vm247_vm0, %v1239_v2, 0  ;;  %405 = vperm.xlu0 %1310, %v402_v6   ;;  %v1394_v13 = vld [vmem:[#allocation3 + $0x10] ss:$28 sps:$4 sm:$0xff]   ;;  %v1397_v14 = vld [vmem:[#allocation3 + $0x18] ss:$28 sps:$4 sm:$0xff]  }
  0x4c   : > { %894 = vmatprep.subr.bf16.mxu1 %v1355_v31  ;;  %v1401_v18 = vld [vmem:[#allocation3 + $0x50] ss:$28 sps:$4 sm:$0xff]   ;;  %v1406_v23 = vld [vmem:[#allocation3 + $0xb8] ss:$28 sps:$4 sm:$0xff]   ;;  %v1420_v31 = vld [vmem:[#allocation3 + $0x164] ss:$28 sps:$4 sm:$0xff]  }
  0x4d   : > { %926 = vmatpush1.bf16.msra.mxu0 %v1327_v20  ;;  %v1402_v20 = vld [vmem:[#allocation3 + $0x80] ss:$28 sps:$4 sm:$0xff]   ;;  %v1410_v26 = vld [vmem:[#allocation3 + $0xf0] ss:$28 sps:$4 sm:$0xff]   ;;  %v1413_v27 = vld [vmem:[#allocation3 + $0xf8] ss:$28 sps:$4 sm:$0xff]  }
  0x4e   : > { %927 = vmatprep.subr.bf16.mxu0 %v1335_v21  ;;  %v1405_v21 = vld [vmem:[#allocation3 + $0x88] ss:$28 sps:$4 sm:$0xff]   ;;  %v1417_v30 = vld [vmem:[#allocation3 + $0x130] ss:$28 sps:$4 sm:$0xff]   ;;  %s1053_s19 = scalar_lea.sflag [#allocation5], %s203_s9  ;;  %s1473_s23 = scalar_lea.vmem %s1709_s13, 896 }
  0x4f   : > { %895 = vmatpush1.bf16.msra.mxu1 %v1360_v34  ;;  %v1424_v34 = vld [vmem:[#allocation3 + $0x19c] ss:$28 sps:$4 sm:$0xff]   ;;  %p1474_p6 = scmp.ne.s32.totalorder %s1709_s13, %s1473_s23  ;;  %p1766_p9 = scmp.ne.s32.totalorder %s1759_s25, 0 }
  0x50   : > { %896 = vmatprep.subr.bf16.mxu1 %v1361_v36  ;;  %v1425_v36 = vld [vmem:[#allocation3 + $0x1a0] ss:$28 sps:$4 sm:$0xff]   ;;  %s1545_s28 = smov [#allocation6]  }
  0x51   : > { %928 = vmatpush1.bf16.msra.mxu0 %v1333_v24  ;;  %v1409_v24 = vld [vmem:[#allocation3 + $0xc0] ss:$28 sps:$4 sm:$0xff]   ;;  %p1475_p10 = pnand %p1474_p6, %p1766_p9  ;;  %s1477_s29 = sshll.u32 %s1545_s28, 4  ;;  %s1478_s29 = int_to_ptr.vmem [resolvable:$false] %s1477_s29 }
  0x52   : > { %929 = vmatprep.subr.bf16.mxu0 %v1341_v25  ;;  %v1412_v25 = vld [vmem:[#allocation3 + $0xf4] ss:$28 sps:$4 sm:$0xff]   ;;  %s1479_s30 = scalar_lea.vmem %s1478_s29, 1792  ;;  %p1480_p2 = scmp.lt.s32.totalorder %s1709_s13, %s1478_s29 }
  0x53   : > { %897 = vmatpush1.bf16.msra.mxu1 %v1366_v38  ;;  %v1426_v38 = vld [vmem:[#allocation3 + $0x1d0] ss:$28 sps:$4 sm:$0xff]   ;;  %p1476_p12 = pneg %p1475_p10  ;;  %p1481_p3 = scmp.lt.s32.totalorder %s1479_s30, %s1473_s23 }
  0x54   : > { %898 = vmatprep.subr.bf16.mxu1 %v1367_v39  ;;  %v1429_v39 = vld [vmem:[#allocation3 + $0x1d8] ss:$28 sps:$4 sm:$0xff]  }
  0x55   : > { %930 = vmatpush1.bf16.msra.mxu0 %v1339_v28  ;;  %v1416_v28 = vld [vmem:[#allocation3 + $0x12c] ss:$28 sps:$4 sm:$0xff]   ;;  %p1482_p4 = por %p1481_p3, %p1480_p2 }
  0x56   : > { %931 = vmatprep.subr.bf16.mxu0 %v1347_v29  ;;  %v1414_v29 = vld [vmem:[#allocation3 + $0x128] ss:$28 sps:$4 sm:$0xff]  }
  0x57   : > { %899 = vmatpush1.bf16.msra.mxu1 %v1372_v42  ;;  %v1433_v42 = vld [vmem:[#allocation3 + $0x210] ss:$28 sps:$4 sm:$0xff]   ;;  %p1483_p7 = pnand %p1482_p4, %p1476_p12 }
  0x58   : > { %900 = vmatprep.subr.bf16.mxu1 %v1373_v43  ;;  %v1436_v43 = vld [vmem:[#allocation3 + $0x244] ss:$28 sps:$4 sm:$0xff]  }
  0x59   : > { %932 = vmatpush1.bf16.msra.mxu0 %v1345_v32  ;;  %v1418_v32 = vld [vmem:[#allocation3 + $0x160] ss:$28 sps:$4 sm:$0xff]  }
  0x5a   : > { %933 = vmatprep.subr.bf16.mxu0 %v1353_v33  ;;  %v1421_v33 = vld [vmem:[#allocation3 + $0x168] ss:$28 sps:$4 sm:$0xff]  }
  0x5b   : > { %901 = vmatpush1.bf16.msra.mxu1 %v1378_v46  ;;  %v1440_v46 = vld [vmem:[#allocation3 + $0x27c] ss:$28 sps:$4 sm:$0xff]  }
  0x5c   : > { %902 = vmatprep.subr.bf16.mxu1 %v1379_v52  ;;  %v1444_v52 = vld [vmem:[#allocation3 + $0x2b8] ss:$0 sps:$4 sm:$0x33]  }
  0x5d   : > { %934 = vmatpush1.bf16.msra.mxu0 %v1351_v35  ;;  %v1422_v35 = vld [vmem:[#allocation3 + $0x198] ss:$28 sps:$4 sm:$0xff]  }
  0x5e   : > { %935 = vmatprep.subr.bf16.mxu0 %v1359_v37  ;;  %v1428_v37 = vld [vmem:[#allocation3 + $0x1d4] ss:$28 sps:$4 sm:$0xff]  }
  0x5f   : > { %903 = vmatpush1.bf16.msra.mxu1 %v1223_v55 }
  0x60   : > { %904 = vmatprep.subr.bf16.mxu1 %v1384_v56 }
  0x61   : > { %936 = vmatpush1.bf16.msra.mxu0 %v1357_v40  ;;  %v1432_v40 = vld [vmem:[#allocation3 + $0x20c] ss:$28 sps:$4 sm:$0xff]  }
  0x62   : > { %937 = vmatprep.subr.bf16.mxu0 %v1365_v41  ;;  %v1430_v41 = vld [vmem:[#allocation3 + $0x208] ss:$28 sps:$4 sm:$0xff]  }
  0x63   : > { %905 = vmatpush1.bf16.msra.mxu1 %v1389_v59 }
  0x64   : > { %1244 = vmatprep.subr.msk.bf16.mxu1 %vm247_vm0, %v1238_v61 }
  0x65   : > { %938 = vmatpush1.bf16.msra.mxu0 %v1363_v44  ;;  %v1434_v44 = vld [vmem:[#allocation3 + $0x240] ss:$28 sps:$4 sm:$0xff]  }
  0x66   : > { %939 = vmatprep.subr.bf16.mxu0 %v1371_v45  ;;  %v1437_v45 = vld [vmem:[#allocation3 + $0x248] ss:$28 sps:$4 sm:$0xff]  }
  0x67   : > { %907 = vmatpush1.bf16.msra.mxu1 %v862_v3 }
  0x68   : > { %964 = vmatprep.subr.bf16.mxu1 %v1396_v5 }
  0x69   : > { %940 = vmatpush1.bf16.msra.mxu0 %v1369_v47  ;;  %v400_v47 = vld [vmem:[#allocation3 + $0x2b0] sm:$0x33] }
  0x6a   : > { %941 = vmatprep.subr.bf16.mxu0 %v1377_v48  ;;  %v1438_v48 = vld [vmem:[#allocation3 + $0x278] ss:$28 sps:$4 sm:$0xff]   ;;  %v1242_v50 = vcombine.high %v400_v47, %v400_v47  ;;  %v1241_v51 = vcombine.low %v400_v47, %v400_v47 }
  0x6d   : > { %942 = vmatpush1.bf16.msra.mxu0 %v1375_v49  ;;  %v1441_v49 = vld [vmem:[#allocation3 + $0x280] ss:$28 sps:$4 sm:$0xff]  }
  0x6e   : > { %943 = vmatprep.subr.bf16.mxu0 %v1383_v54  ;;  %v880_v54 = vsel %vm247_vm0, %v1444_v52, 0 }
  0x71   : > { %944 = vmatpush1.bf16.msra.mxu0 %v1381_v53  ;;  %v874_v53 = vsel %vm247_vm0, %v1241_v51, 0 }
  0x72   : > { %945 = vmatprep.subr.bf16.mxu0 %v1388_v57 }
  0x75   : > { %946 = vmatpush1.bf16.msra.mxu0 %v1386_v58 }
  0x76   : > { %1246 = vmatprep.subr.msk.bf16.mxu0 %vm247_vm0, %v1240_v1 }
  0x79   : > { %948 = vmatpush1.bf16.msra.mxu0 %v868_v4 }
  0x7a   : > { %1005 = vmatprep.subr.bf16.mxu0 %v1544_v0 }
  0xca   : > { %v406_v55 = vpop.permute.xlu0 %405 }
 0x11b   : > { %v288_v7 = vpop.f32.mrb[0].mxu0 }
 0x11c   : > { %v290_v8 = vpop.f32.mrb[1].mxu0  ;;  %v1675_v15 = vpack.c.bf16 %v288_v7, %v288_v7 }
 0x11d   : > { %297 = vst.msk [vmem:[#allocation2 + $0x8] sm:$0xff] %vm296_vm2, %v290_v8  ;;  %v292_v9 = vpop.f32.mrb[2].mxu0 }
 0x11e   : > { %v293_v10 = vpop.f32.mrb[3].mxu0 }
 0x124   : > { %v299_v11 = vld [vmem:[#allocation2 + $0x8] sm:$0xff] }
 0x125   : > { %v301_v12 = vpack.c.bf16 %v299_v11, %v299_v11 }
 0x127   : > { %1245 = vmatprep.mubr.msk.bf16.mxu1 %vm296_vm2, %v301_v12  ;;  %1247 = vmatprep.mubr.msk.bf16.mxu0 %vm296_vm2, %v301_v12 }
 0x128   : > { %915 = vmatmul.mubr.bf16.vlgmr.msra.gmra.mrb[0].mxu1 %v1675_v15  ;;  %956 = vmatmul.mubr.bf16.vlgmr.msra.gmra.mrb[4].mxu0 %v1675_v15 }
 0x129   : > { %965 = vmatpush1.bf16.msra.mxu1 %v1394_v13  ;;  %1006 = vmatpush1.bf16.msra.mxu0 %v1397_v14 }
 0x12a   : > { %1249 = vmatprep.mubr.msk.bf16.mxu1 %vm296_vm2, %v301_v12  ;;  %1250 = vmatprep.mubr.msk.bf16.mxu0 %vm296_vm2, %v301_v12 }
 0x12b   : > { %966 = vmatprep.subr.bf16.mxu1 %v1400_v16  ;;  %1007 = vmatprep.subr.bf16.mxu0 %v1544_v0 }
 0x12d   : > { %967 = vmatpush1.bf16.msra.mxu1 %v1398_v17  ;;  %1008 = vmatpush1.bf16.msra.mxu0 %v1401_v18 }
 0x12e   : > { %968 = vmatprep.subr.bf16.mxu1 %v1404_v19  ;;  %1009 = vmatprep.subr.bf16.mxu0 %v1544_v0 }
 0x131   : > { %969 = vmatpush1.bf16.msra.mxu1 %v1402_v20  ;;  %1010 = vmatpush1.bf16.msra.mxu0 %v1405_v21 }
 0x132   : > { %970 = vmatprep.subr.bf16.mxu1 %v1408_v22  ;;  %1011 = vmatprep.subr.bf16.mxu0 %v1544_v0 }
 0x135   : > { %971 = vmatpush1.bf16.msra.mxu1 %v1406_v23  ;;  %1012 = vmatpush1.bf16.msra.mxu0 %v1409_v24 }
 0x136   : > { %972 = vmatprep.subr.bf16.mxu1 %v1412_v25  ;;  %1013 = vmatprep.subr.bf16.mxu0 %v1544_v0 }
 0x139   : > { %973 = vmatpush1.bf16.msra.mxu1 %v1410_v26  ;;  %1014 = vmatpush1.bf16.msra.mxu0 %v1413_v27 }
 0x13a   : > { %974 = vmatprep.subr.bf16.mxu1 %v1416_v28  ;;  %1015 = vmatprep.subr.bf16.mxu0 %v1544_v0 }
 0x13d   : > { %975 = vmatpush1.bf16.msra.mxu1 %v1414_v29  ;;  %1016 = vmatpush1.bf16.msra.mxu0 %v1417_v30 }
 0x13e   : > { %976 = vmatprep.subr.bf16.mxu1 %v1420_v31  ;;  %1017 = vmatprep.subr.bf16.mxu0 %v1544_v0 }
 0x141   : > { %977 = vmatpush1.bf16.msra.mxu1 %v1418_v32  ;;  %1018 = vmatpush1.bf16.msra.mxu0 %v1421_v33 }
 0x142   : > { %978 = vmatprep.subr.bf16.mxu1 %v1424_v34  ;;  %1019 = vmatprep.subr.bf16.mxu0 %v1544_v0 }
 0x145   : > { %979 = vmatpush1.bf16.msra.mxu1 %v1422_v35  ;;  %1020 = vmatpush1.bf16.msra.mxu0 %v1425_v36 }
 0x146   : > { %980 = vmatprep.subr.bf16.mxu1 %v1428_v37  ;;  %1021 = vmatprep.subr.bf16.mxu0 %v1544_v0 }
 0x149   : > { %981 = vmatpush1.bf16.msra.mxu1 %v1426_v38  ;;  %1022 = vmatpush1.bf16.msra.mxu0 %v1429_v39 }
 0x14a   : > { %982 = vmatprep.subr.bf16.mxu1 %v1432_v40  ;;  %1023 = vmatprep.subr.bf16.mxu0 %v1544_v0 }
 0x14d   : > { %983 = vmatpush1.bf16.msra.mxu1 %v1430_v41  ;;  %1024 = vmatpush1.bf16.msra.mxu0 %v1433_v42 }
 0x14e   : > { %984 = vmatprep.subr.bf16.mxu1 %v1436_v43  ;;  %1025 = vmatprep.subr.bf16.mxu0 %v1544_v0 }
 0x151   : > { %985 = vmatpush1.bf16.msra.mxu1 %v1434_v44  ;;  %1026 = vmatpush1.bf16.msra.mxu0 %v1437_v45 }
 0x152   : > { %986 = vmatprep.subr.bf16.mxu1 %v1440_v46  ;;  %1027 = vmatprep.subr.bf16.mxu0 %v1544_v0 }
 0x155   : > { %987 = vmatpush1.bf16.msra.mxu1 %v1438_v48  ;;  %1028 = vmatpush1.bf16.msra.mxu0 %v1441_v49 }
 0x156   : > { %1248 = vmatprep.subr.msk.bf16.mxu1 %vm247_vm0, %v1242_v50  ;;  %1029 = vmatprep.subr.bf16.mxu0 %v1544_v0 }
 0x159   : > { %989 = vmatpush1.bf16.msra.mxu1 %v874_v53  ;;  %1030 = vmatpush1.bf16.msra.mxu0 %v880_v54 }
 0x15c   : > { %997 = vmatmul.mubr.bf16.vlgmr.msra.gmra.mrb[4].mxu1 %v1675_v15  ;;  %1038 = vmatmul.mubr.bf16.vlgmr.msra.gmra.mrb[8].mxu0 %v1675_v15 }
 0x1fb   : > { %v916_v56 = vpop.f32.mrb[0].mxu1  ;;  %v957_v57 = vpop.f32.mrb[4].mxu0 }
 0x1fc   : > { %v917_v58 = vadd.f32 %v916_v56, %v406_v55  ;;  %v958_v59 = vadd.f32 %v957_v57, %v406_v55  ;;  %v918_v0 = vpop.f32.mrb[1].mxu1  ;;  %v959_v60 = vpop.f32.mrb[5].mxu0 }
 0x1fd   : > { %v919_v61 = vadd.f32 %v918_v0, %v406_v55  ;;  %v960_v62 = vadd.f32 %v959_v60, %v406_v55  ;;  %v920_v63 = vpop.f32.mrb[2].mxu1  ;;  %v961_v1 = vpop.f32.mrb[6].mxu0 }
 0x1fe   : > { %1045 = vst [vmem:[%s205_s11] sm:$0xff] %v917_v58  ;;  %1047 = vst [vmem:[%s205_s11 + $0x10] sm:$0xff] %v958_v59  ;;  %v921_v2 = vpop.f32.mrb[3].mxu1  ;;  %v962_v3 = vpop.f32.mrb[7].mxu0 }
 0x1ff   : > { %1046 = vst [vmem:[%s205_s11 + $0x8] sm:$0xff] %v919_v61  ;;  %1048 = vst [vmem:[%s205_s11 + $0x18] sm:$0xff] %v960_v62 }
 0x22f   : > { %v998_v4 = vpop.f32.mrb[4].mxu1  ;;  %v1039_v5 = vpop.f32.mrb[8].mxu0 }
 0x230   : > { %v999_v6 = vadd.f32 %v998_v4, %v406_v55  ;;  %v1040_v7 = vadd.f32 %v1039_v5, %v406_v55  ;;  %v1000_v8 = vpop.f32.mrb[5].mxu1  ;;  %v1041_v9 = vpop.f32.mrb[9].mxu0 }
 0x231   : > { %v1001_v10 = vadd.f32 %v1000_v8, %v406_v55  ;;  %v1002_v11 = vpop.f32.mrb[6].mxu1  ;;  %v1042_v12 = vpop.f32.mrb[10].mxu0 }
 0x232   : > { %1049 = vst [vmem:[%s205_s11 + $0x20] sm:$0xff] %v999_v6  ;;  %1051 = vst [vmem:[%s205_s11 + $0x30] sm:$0xff] %v1040_v7  ;;  %v1003_v13 = vpop.f32.mrb[7].mxu1  ;;  %v1043_v14 = vpop.f32.mrb[11].mxu0 }
 0x233   : > { %1050 = vst [vmem:[%s205_s11 + $0x28] sm:$0xff] %v1001_v10 }
 0x234   : > { %1486 = shalt.err (!%p1483_p7)
}
 0x235   : > { %s1487_s27 = scalar_lea.hbm %s1707_s22, 896  ;;  %s1491_s7 = scalar_lea.hbm %s1755_s4, 1792 }
 0x236   : > { %p1488_p8 = scmp.ne.s32.totalorder %s1707_s22, %s1487_s27  ;;  %p1492_p1 = scmp.lt.u32.totalorder %s1707_s22, %s1755_s4 }
 0x237   : > { %p1493_p0 = scmp.lt.u32.totalorder %s1491_s7, %s1487_s27  ;;  %p1495_p6 = scmp.lt.u32.totalorder %s1487_s27, %s1707_s22 }
 0x238   : > { %p1489_p11 = pnand %p1488_p8, %p1766_p9 }
 0x239   : > { %p1494_p5 = por %p1493_p0, %p1492_p1 }
 0x23a   : > { %p1490_p13 = pneg %p1489_p11 }
 0x23b   : > { %p1496_p10 = por %p1495_p6, %p1494_p5 }
 0x23d   : > { %p1497_p12 = pnand %p1496_p10, %p1490_p13 }
 0x23f   : > { %1500 = shalt.err (!%p1497_p12)
}
 0x240   : > { %1261 = dma.vmem_to_hbm [thread:$0]  (%p1766_p9), %s1709_s13, 896, %s1707_s22, %s1053_s19  }
 0x241 PF: > { %p1273_p2 = scmp.ge.s32.totalorder %s1539_s18, 2  ;;  %s1079_s10 = sand.u32 1, %s1527_s15  }
 0x242   : > { %p1767_p3 = scmp.ne.s32.totalorder %s1760_s26, 0  ;;  %s1080_s11 = scalar_lea.sflag [#allocation5], %s1079_s10 }
 0x244   : > { %p1268_p4 = pnand %p1273_p2, %p1767_p3 }
 0x246   : > { %1522 = dma.done.wait (!%p1268_p4), %s1080_s11, 896  }
 0x247   : > { %1524 = vsyncadd (!%p1268_p4), %s1080_s11, 4294966400  ;;  %p15_p7 = scmp.ge.s32.totalorder %s1596_s21, 4   ;;  %s1768_s15 = smov %s1531_s16 }
 0x248   : > { %s1769_s16 = smov %s1535_s17  ;;  %s1770_s17 = smov %s1607_s24 }
 0x249   : > { %s1771_s18 = smov %s1596_s21  ;;  %17 = sbr.rel (!%p15_p7) target bundleno = 4 (0x4), region = 76 }
 0x250   :  { %1085 = vsyncpa [#allocation4], 1 }
 0x251   :  { %1087 = vsyncpa [#allocation4 + $0x1], 1 }
 0x252   :  { %1088 = vsyncpa [#allocation5], 1 }
 0x253   :  { %1090 = vsyncpa [#allocation5 + $0x1], 1 }

</bundles_post_ra>
